<compile_context>
chip_gen: v7x
topology: tpu7x:2x2x1
jax: 0.10.0
libtpu: 0.0.40
codegen_flags: <defaults>
</compile_context>

<pallas_src>
import jax
import jax.numpy as jnp
from jax.experimental import pallas as pl
from jax.experimental.pallas import tpu as pltpu


def gru_seq_kernel(x2_ref, h0_ref, wi_ref, wh_ref, bgi_ref, bhn_ref,
                   out_ref, gi_scr):
    S, B, H = out_ref.shape
    H3 = 3 * H

    # ---- Prologue (independent of h, off the serial critical path):
    # input projection for the whole sequence as ONE MXU pass, with the
    # (b_ih + b_hh) bias for r/z and b_ih for n already folded in.
    gi_scr[...] = (
        jnp.dot(x2_ref[...], wi_ref[...], preferred_element_type=jnp.float32)
        + bgi_ref[...]
    )

    # Hoist invariant loads out of the recurrence.
    wh = wh_ref[...]       # (H, 3H) fused hidden->gate weights (r, z, n)
    b_hn = bhn_ref[...]    # (1, H)  b_hh of the n gate (lives inside r*(...))
    h = h0_ref[...]        # (B, H)  learned initial hidden state

    # ---- Time recurrence, fully unrolled at trace time (S static & small),
    # giving the scheduler visibility across steps; one fused matmul per step.
    for s in range(S):
        gi_s = gi_scr[pl.ds(s * B, B), :]                          # (B, 3H)
        gh = jnp.dot(h, wh, preferred_element_type=jnp.float32)    # (B, 3H)

        # r and z share the (bias-folded) add + sigmoid over the first 2H
        # columns -> one EUP pass over a lane-aligned chunk, then split.
        rz = jax.nn.sigmoid(gi_s[:, 0:2 * H] + gh[:, 0:2 * H])
        r = rz[:, 0:H]
        z = rz[:, H:2 * H]
        n = jnp.tanh(gi_s[:, 2 * H:H3] + r * (gh[:, 2 * H:H3] + b_hn))
        # h_new = (1-z)*n + z*h  ==  n + z*(h - n)   (one fewer VPU op)
        h = n + z * (h - n)

        # VMEM-resident store; the single HBM writeback DMA happens once at
        # the end of the (only) grid step.  Fused ReLU (ReLU is NOT carried).
        out_ref[s] = jnp.maximum(h, 0.0).astype(out_ref.dtype)


def gru_block_forward(x, h0_param, w_ih, w_hh, b_ih, b_hh):
    """x: (S, B, I) f32; h0_param: (1, 1, H); w_ih: (3, I, H); w_hh: (3, H, H);
    b_ih/b_hh: (3, 1, H).  Returns relu(GRU(x, h0)) of shape (S, B, H)."""
    S, B, I = x.shape
    H = w_hh.shape[-1]
    H3 = 3 * H

    # --- Parameter packing (cheap trace-time glue, fused into XLA prologue).
    wi_cat = jnp.concatenate([w_ih[0], w_ih[1], w_ih[2]], axis=1)   # (I, 3H)
    wh_cat = jnp.concatenate([w_hh[0], w_hh[1], w_hh[2]], axis=1)   # (H, 3H)
    # r/z biases commute -> fold b_ih + b_hh; n keeps only b_ih here
    # (b_hh_n must stay inside r * (h@W_hn + b_hn)).
    bias_gi = jnp.concatenate(
        [b_ih[0] + b_hh[0], b_ih[1] + b_hh[1], b_ih[2]], axis=1)    # (1, 3H)
    b_hn = b_hh[2]                                                  # (1, H)

    # h0.repeat(1, batch, 1) -> (B, H)
    h0 = jnp.broadcast_to(h0_param[0, 0], (B, H)).astype(jnp.float32)

    # Flatten the sequence so the kernel's prologue does the whole input
    # projection as a single (S*B, I) x (I, 3H) matmul.
    x2 = x.reshape(S * B, I).astype(jnp.float32)

    grid_spec = pltpu.PrefetchScalarGridSpec(
        num_scalar_prefetch=0,
        grid=(1,),  # whole problem in one grid step: no per-t pipeline overhead
        in_specs=[
            pl.BlockSpec((S * B, I), lambda i: (0, 0)),   # x, flattened
            pl.BlockSpec((B, H), lambda i: (0, 0)),       # h0
            pl.BlockSpec((I, H3), lambda i: (0, 0)),      # W_ih fused (r,z,n)
            pl.BlockSpec((H, H3), lambda i: (0, 0)),      # W_hh fused (r,z,n)
            pl.BlockSpec((1, H3), lambda i: (0, 0)),      # folded gi bias
            pl.BlockSpec((1, H), lambda i: (0, 0)),       # b_hh of n gate
        ],
        out_specs=pl.BlockSpec((S, B, H), lambda i: (0, 0, 0)),
        scratch_shapes=[pltpu.VMEM((S * B, H3), jnp.float32)],  # staged gi
    )

    return pl.pallas_call(
        gru_seq_kernel,
        out_shape=jax.ShapeDtypeStruct((S, B, H), jnp.float32),
        grid_spec=grid_spec,
        compiler_params=pltpu.CompilerParams(
            dimension_semantics=("arbitrary",)),  # sequential recurrence
    )(x2, h0, wi_cat, wh_cat, bias_gi, b_hn)


def gru_block_reference(x, h0_param, w_ih, w_hh, b_ih, b_hh):
    """Pure-JAX reference matching PyTorch nn.GRU + ReLU semantics."""
    S, B, I = x.shape
    H = w_hh.shape[-1]
    h = jnp.broadcast_to(h0_param[0, 0], (B, H)).astype(jnp.float32)

    def step(h, x_t):
        gi_r = x_t @ w_ih[0] + b_ih[0]
        gi_z = x_t @ w_ih[1] + b_ih[1]
        gi_n = x_t @ w_ih[2] + b_ih[2]
        gh_r = h @ w_hh[0] + b_hh[0]
        gh_z = h @ w_hh[1] + b_hh[1]
        gh_n = h @ w_hh[2] + b_hh[2]
        r = jax.nn.sigmoid(gi_r + gh_r)
        z = jax.nn.sigmoid(gi_z + gh_z)
        n = jnp.tanh(gi_n + r * gh_n)
        h_new = (1.0 - z) * n + z * h
        return h_new, h_new

    _, outs = jax.lax.scan(step, h, x)
    return jnp.maximum(outs, 0.0)


if __name__ == "__main__":
    # Small shapes consistent with GRUBlock(input_size=7, hid_size=64):
    S, B, I, H = 8, 2, 7, 64

    key = jax.random.PRNGKey(0)
    kx, kh0, kwi, kwh, kbi, kbh = jax.random.split(key, 6)

    scale = 1.0 / jnp.sqrt(H)  # matches PyTorch GRU init range
    x = jax.random.normal(kx, (S, B, I), dtype=jnp.float32)
    h0_param = jax.random.normal(kh0, (1, 1, H), dtype=jnp.float32)  # nn.Parameter h0
    w_ih = jax.random.uniform(kwi, (3, I, H), jnp.float32, -scale, scale)
    w_hh = jax.random.uniform(kwh, (3, H, H), jnp.float32, -scale, scale)
    b_ih = jax.random.uniform(kbi, (3, 1, H), jnp.float32, -scale, scale)
    b_hh = jax.random.uniform(kbh, (3, 1, H), jnp.float32, -scale, scale)

    out = gru_block_forward(x, h0_param, w_ih, w_hh, b_ih, b_hh)
    out = jax.block_until_ready(out)

    ref = gru_block_reference(x, h0_param, w_ih, w_hh, b_ih, b_hh)
    assert out.shape == (S, B, H)
    assert jnp.allclose(out, ref, atol=1e-4, rtol=1e-4), "mismatch vs reference"

    print("KERNEL_OK")
</pallas_src>

<mosaic_0001>
module attributes {stable_mosaic.version = 11 : i64} {
  func.func @gru_seq_kernel(%arg0: i32, %arg1: memref<16x7xf32, #tpu.memory_space<vmem>>, %arg2: memref<2x64xf32, #tpu.memory_space<vmem>>, %arg3: memref<7x192xf32, #tpu.memory_space<vmem>>, %arg4: memref<64x192xf32, #tpu.memory_space<vmem>>, %arg5: memref<1x192xf32, #tpu.memory_space<vmem>>, %arg6: memref<1x64xf32, #tpu.memory_space<vmem>>, %arg7: memref<8x2x64xf32, #tpu.memory_space<vmem>>, %arg8: memref<16x192xf32, #tpu.memory_space<vmem>>) attributes {dimension_semantics = [#tpu.dimension_semantics<arbitrary>], iteration_bounds = array<i64: 1>, scalar_prefetch = 0 : i64, scratch_operands = 1 : i64, tpu.core_type = #tpu.core_type<tc>, window_params = [{pipeline_mode = #tpu.pipeline_mode<synchronous>, transform_indices = @transform_0, window_bounds = array<i64: 16, 7>}, {pipeline_mode = #tpu.pipeline_mode<synchronous>, transform_indices = @transform_1, window_bounds = array<i64: 2, 64>}, {pipeline_mode = #tpu.pipeline_mode<synchronous>, transform_indices = @transform_2, window_bounds = array<i64: 7, 192>}, {pipeline_mode = #tpu.pipeline_mode<synchronous>, transform_indices = @transform_3, window_bounds = array<i64: 64, 192>}, {pipeline_mode = #tpu.pipeline_mode<synchronous>, transform_indices = @transform_4, window_bounds = array<i64: 1, 192>}, {pipeline_mode = #tpu.pipeline_mode<synchronous>, transform_indices = @transform_5, window_bounds = array<i64: 1, 64>}, {pipeline_mode = #tpu.pipeline_mode<synchronous>, transform_indices = @transform_6, window_bounds = array<i64: 8, 2, 64>}]} {
    %c0 = arith.constant 0 : index
    %c0_0 = arith.constant 0 : index
    %0 = vector.load %arg1[%c0, %c0_0] : memref<16x7xf32, #tpu.memory_space<vmem>>, vector<16x7xf32>
    %c0_1 = arith.constant 0 : index
    %c0_2 = arith.constant 0 : index
    %1 = vector.load %arg3[%c0_1, %c0_2] : memref<7x192xf32, #tpu.memory_space<vmem>>, vector<7x192xf32>
    %cst = arith.constant dense<0.000000e+00> : vector<16x192xf32>
    %2 = tpu.matmul %0, %1, %cst {dimension_numbers = #tpu.dot_dimension_numbers<[1], [0], [0], [1], [0, 0, 1, 1], [], []>} : vector<16x7xf32>, vector<7x192xf32>, vector<16x192xf32> -> vector<16x192xf32>
    %c0_3 = arith.constant 0 : index
    %c0_4 = arith.constant 0 : index
    %3 = vector.load %arg5[%c0_3, %c0_4] : memref<1x192xf32, #tpu.memory_space<vmem>>, vector<1x192xf32>
    %4 = vector.broadcast %3 : vector<1x192xf32> to vector<16x192xf32>
    %5 = arith.addf %2, %4 : vector<16x192xf32>
    %c0_5 = arith.constant 0 : index
    %c0_6 = arith.constant 0 : index
    %6 = vector.load %arg8[%c0_5, %c0_6] : memref<16x192xf32, #tpu.memory_space<vmem>>, vector<16x192xf32>
    tpu.vector_store %arg8[%c0_5, %c0_6], %5 {strides = array<i32>} : memref<16x192xf32, #tpu.memory_space<vmem>>, vector<16x192xf32>,
    %c0_7 = arith.constant 0 : index
    %c0_8 = arith.constant 0 : index
    %7 = vector.load %arg4[%c0_7, %c0_8] : memref<64x192xf32, #tpu.memory_space<vmem>>, vector<64x192xf32>
    %c0_9 = arith.constant 0 : index
    %c0_10 = arith.constant 0 : index
    %8 = vector.load %arg6[%c0_9, %c0_10] : memref<1x64xf32, #tpu.memory_space<vmem>>, vector<1x64xf32>
    %c0_11 = arith.constant 0 : index
    %c0_12 = arith.constant 0 : index
    %9 = vector.load %arg2[%c0_11, %c0_12] : memref<2x64xf32, #tpu.memory_space<vmem>>, vector<2x64xf32>
    %c0_13 = arith.constant 0 : index
    %c0_14 = arith.constant 0 : index
    %10 = vector.load %arg8[%c0_13, %c0_14] : memref<16x192xf32, #tpu.memory_space<vmem>>, vector<2x192xf32>
    %cst_15 = arith.constant dense<0.000000e+00> : vector<2x192xf32>
    %11 = tpu.matmul %9, %7, %cst_15 {dimension_numbers = #tpu.dot_dimension_numbers<[1], [0], [0], [1], [0, 0, 1, 1], [], []>} : vector<2x64xf32>, vector<64x192xf32>, vector<2x192xf32> -> vector<2x192xf32>
    %12 = vector.extract_strided_slice %10 {offsets = [0, 0], sizes = [2, 128], strides = [1, 1]} : vector<2x192xf32> to vector<2x128xf32>
    %13 = vector.extract_strided_slice %11 {offsets = [0, 0], sizes = [2, 128], strides = [1, 1]} : vector<2x192xf32> to vector<2x128xf32>
    %14 = arith.addf %12, %13 : vector<2x128xf32>
    %15 = arith.negf %14 : vector<2x128xf32>
    %16 = math.exp %15 : vector<2x128xf32>
    %cst_16 = arith.constant 1.000000e+00 : f32
    %17 = vector.broadcast %cst_16 : f32 to vector<2x128xf32>
    %18 = arith.addf %17, %16 : vector<2x128xf32>
    %19 = arith.divf %17, %18 : vector<2x128xf32>
    %20 = vector.extract_strided_slice %19 {offsets = [0, 0], sizes = [2, 64], strides = [1, 1]} : vector<2x128xf32> to vector<2x64xf32>
    %21 = vector.extract_strided_slice %19 {offsets = [0, 64], sizes = [2, 64], strides = [1, 1]} : vector<2x128xf32> to vector<2x64xf32>
    %22 = vector.extract_strided_slice %10 {offsets = [0, 128], sizes = [2, 64], strides = [1, 1]} : vector<2x192xf32> to vector<2x64xf32>
    %23 = vector.extract_strided_slice %11 {offsets = [0, 128], sizes = [2, 64], strides = [1, 1]} : vector<2x192xf32> to vector<2x64xf32>
    %24 = vector.broadcast %8 : vector<1x64xf32> to vector<2x64xf32>
    %25 = arith.addf %23, %24 : vector<2x64xf32>
    %26 = arith.mulf %20, %25 : vector<2x64xf32>
    %27 = arith.addf %22, %26 : vector<2x64xf32>
    %28 = math.tanh %27 : vector<2x64xf32>
    %29 = arith.subf %9, %28 : vector<2x64xf32>
    %30 = arith.mulf %21, %29 : vector<2x64xf32>
    %31 = arith.addf %28, %30 : vector<2x64xf32>
    %cst_17 = arith.constant 0.000000e+00 : f32
    %32 = vector.broadcast %cst_17 : f32 to vector<2x64xf32>
    %33 = arith.maximumf %31, %32 : vector<2x64xf32>
    %c0_18 = arith.constant 0 : index
    %c0_19 = arith.constant 0 : index
    %c0_20 = arith.constant 0 : index
    %34 = vector.load %arg7[%c0_18, %c0_19, %c0_20] : memref<8x2x64xf32, #tpu.memory_space<vmem>>, vector<1x2x64xf32>
    %35 = vector.shape_cast %34 : vector<1x2x64xf32> to vector<2x64xf32>
    %36 = vector.shape_cast %33 : vector<2x64xf32> to vector<1x2x64xf32>
    tpu.vector_store %arg7[%c0_18, %c0_19, %c0_20], %36 {strides = array<i32>} : memref<8x2x64xf32, #tpu.memory_space<vmem>>, vector<1x2x64xf32>,
    %c2 = arith.constant 2 : index
    %c0_21 = arith.constant 0 : index
    %37 = vector.load %arg8[%c2, %c0_21] : memref<16x192xf32, #tpu.memory_space<vmem>>, vector<2x192xf32>
    %cst_22 = arith.constant dense<0.000000e+00> : vector<2x192xf32>
    %38 = tpu.matmul %31, %7, %cst_22 {dimension_numbers = #tpu.dot_dimension_numbers<[1], [0], [0], [1], [0, 0, 1, 1], [], []>} : vector<2x64xf32>, vector<64x192xf32>, vector<2x192xf32> -> vector<2x192xf32>
    %39 = vector.extract_strided_slice %37 {offsets = [0, 0], sizes = [2, 128], strides = [1, 1]} : vector<2x192xf32> to vector<2x128xf32>
    %40 = vector.extract_strided_slice %38 {offsets = [0, 0], sizes = [2, 128], strides = [1, 1]} : vector<2x192xf32> to vector<2x128xf32>
    %41 = arith.addf %39, %40 : vector<2x128xf32>
    %42 = arith.negf %41 : vector<2x128xf32>
    %43 = math.exp %42 : vector<2x128xf32>
    %cst_23 = arith.constant 1.000000e+00 : f32
    %44 = vector.broadcast %cst_23 : f32 to vector<2x128xf32>
    %45 = arith.addf %44, %43 : vector<2x128xf32>
    %46 = arith.divf %44, %45 : vector<2x128xf32>
    %47 = vector.extract_strided_slice %46 {offsets = [0, 0], sizes = [2, 64], strides = [1, 1]} : vector<2x128xf32> to vector<2x64xf32>
    %48 = vector.extract_strided_slice %46 {offsets = [0, 64], sizes = [2, 64], strides = [1, 1]} : vector<2x128xf32> to vector<2x64xf32>
    %49 = vector.extract_strided_slice %37 {offsets = [0, 128], sizes = [2, 64], strides = [1, 1]} : vector<2x192xf32> to vector<2x64xf32>
    %50 = vector.extract_strided_slice %38 {offsets = [0, 128], sizes = [2, 64], strides = [1, 1]} : vector<2x192xf32> to vector<2x64xf32>
    %51 = vector.broadcast %8 : vector<1x64xf32> to vector<2x64xf32>
    %52 = arith.addf %50, %51 : vector<2x64xf32>
    %53 = arith.mulf %47, %52 : vector<2x64xf32>
    %54 = arith.addf %49, %53 : vector<2x64xf32>
    %55 = math.tanh %54 : vector<2x64xf32>
    %56 = arith.subf %31, %55 : vector<2x64xf32>
    %57 = arith.mulf %48, %56 : vector<2x64xf32>
    %58 = arith.addf %55, %57 : vector<2x64xf32>
    %cst_24 = arith.constant 0.000000e+00 : f32
    %59 = vector.broadcast %cst_24 : f32 to vector<2x64xf32>
    %60 = arith.maximumf %58, %59 : vector<2x64xf32>
    %c1 = arith.constant 1 : index
    %c0_25 = arith.constant 0 : index
    %c0_26 = arith.constant 0 : index
    %61 = vector.load %arg7[%c1, %c0_25, %c0_26] : memref<8x2x64xf32, #tpu.memory_space<vmem>>, vector<1x2x64xf32>
    %62 = vector.shape_cast %61 : vector<1x2x64xf32> to vector<2x64xf32>
    %63 = vector.shape_cast %60 : vector<2x64xf32> to vector<1x2x64xf32>
    tpu.vector_store %arg7[%c1, %c0_25, %c0_26], %63 {strides = array<i32>} : memref<8x2x64xf32, #tpu.memory_space<vmem>>, vector<1x2x64xf32>,
    %c4 = arith.constant 4 : index
    %c0_27 = arith.constant 0 : index
    %64 = vector.load %arg8[%c4, %c0_27] : memref<16x192xf32, #tpu.memory_space<vmem>>, vector<2x192xf32>
    %cst_28 = arith.constant dense<0.000000e+00> : vector<2x192xf32>
    %65 = tpu.matmul %58, %7, %cst_28 {dimension_numbers = #tpu.dot_dimension_numbers<[1], [0], [0], [1], [0, 0, 1, 1], [], []>} : vector<2x64xf32>, vector<64x192xf32>, vector<2x192xf32> -> vector<2x192xf32>
    %66 = vector.extract_strided_slice %64 {offsets = [0, 0], sizes = [2, 128], strides = [1, 1]} : vector<2x192xf32> to vector<2x128xf32>
    %67 = vector.extract_strided_slice %65 {offsets = [0, 0], sizes = [2, 128], strides = [1, 1]} : vector<2x192xf32> to vector<2x128xf32>
    %68 = arith.addf %66, %67 : vector<2x128xf32>
    %69 = arith.negf %68 : vector<2x128xf32>
    %70 = math.exp %69 : vector<2x128xf32>
    %cst_29 = arith.constant 1.000000e+00 : f32
    %71 = vector.broadcast %cst_29 : f32 to vector<2x128xf32>
    %72 = arith.addf %71, %70 : vector<2x128xf32>
    %73 = arith.divf %71, %72 : vector<2x128xf32>
    %74 = vector.extract_strided_slice %73 {offsets = [0, 0], sizes = [2, 64], strides = [1, 1]} : vector<2x128xf32> to vector<2x64xf32>
    %75 = vector.extract_strided_slice %73 {offsets = [0, 64], sizes = [2, 64], strides = [1, 1]} : vector<2x128xf32> to vector<2x64xf32>
    %76 = vector.extract_strided_slice %64 {offsets = [0, 128], sizes = [2, 64], strides = [1, 1]} : vector<2x192xf32> to vector<2x64xf32>
    %77 = vector.extract_strided_slice %65 {offsets = [0, 128], sizes = [2, 64], strides = [1, 1]} : vector<2x192xf32> to vector<2x64xf32>
    %78 = vector.broadcast %8 : vector<1x64xf32> to vector<2x64xf32>
    %79 = arith.addf %77, %78 : vector<2x64xf32>
    %80 = arith.mulf %74, %79 : vector<2x64xf32>
    %81 = arith.addf %76, %80 : vector<2x64xf32>
    %82 = math.tanh %81 : vector<2x64xf32>
    %83 = arith.subf %58, %82 : vector<2x64xf32>
    %84 = arith.mulf %75, %83 : vector<2x64xf32>
    %85 = arith.addf %82, %84 : vector<2x64xf32>
    %cst_30 = arith.constant 0.000000e+00 : f32
    %86 = vector.broadcast %cst_30 : f32 to vector<2x64xf32>
    %87 = arith.maximumf %85, %86 : vector<2x64xf32>
    %c2_31 = arith.constant 2 : index
    %c0_32 = arith.constant 0 : index
    %c0_33 = arith.constant 0 : index
    %88 = vector.load %arg7[%c2_31, %c0_32, %c0_33] : memref<8x2x64xf32, #tpu.memory_space<vmem>>, vector<1x2x64xf32>
    %89 = vector.shape_cast %88 : vector<1x2x64xf32> to vector<2x64xf32>
    %90 = vector.shape_cast %87 : vector<2x64xf32> to vector<1x2x64xf32>
    tpu.vector_store %arg7[%c2_31, %c0_32, %c0_33], %90 {strides = array<i32>} : memref<8x2x64xf32, #tpu.memory_space<vmem>>, vector<1x2x64xf32>,
    %c6 = arith.constant 6 : index
    %c0_34 = arith.constant 0 : index
    %91 = vector.load %arg8[%c6, %c0_34] : memref<16x192xf32, #tpu.memory_space<vmem>>, vector<2x192xf32>
    %cst_35 = arith.constant dense<0.000000e+00> : vector<2x192xf32>
    %92 = tpu.matmul %85, %7, %cst_35 {dimension_numbers = #tpu.dot_dimension_numbers<[1], [0], [0], [1], [0, 0, 1, 1], [], []>} : vector<2x64xf32>, vector<64x192xf32>, vector<2x192xf32> -> vector<2x192xf32>
    %93 = vector.extract_strided_slice %91 {offsets = [0, 0], sizes = [2, 128], strides = [1, 1]} : vector<2x192xf32> to vector<2x128xf32>
    %94 = vector.extract_strided_slice %92 {offsets = [0, 0], sizes = [2, 128], strides = [1, 1]} : vector<2x192xf32> to vector<2x128xf32>
    %95 = arith.addf %93, %94 : vector<2x128xf32>
    %96 = arith.negf %95 : vector<2x128xf32>
    %97 = math.exp %96 : vector<2x128xf32>
    %cst_36 = arith.constant 1.000000e+00 : f32
    %98 = vector.broadcast %cst_36 : f32 to vector<2x128xf32>
    %99 = arith.addf %98, %97 : vector<2x128xf32>
    %100 = arith.divf %98, %99 : vector<2x128xf32>
    %101 = vector.extract_strided_slice %100 {offsets = [0, 0], sizes = [2, 64], strides = [1, 1]} : vector<2x128xf32> to vector<2x64xf32>
    %102 = vector.extract_strided_slice %100 {offsets = [0, 64], sizes = [2, 64], strides = [1, 1]} : vector<2x128xf32> to vector<2x64xf32>
    %103 = vector.extract_strided_slice %91 {offsets = [0, 128], sizes = [2, 64], strides = [1, 1]} : vector<2x192xf32> to vector<2x64xf32>
    %104 = vector.extract_strided_slice %92 {offsets = [0, 128], sizes = [2, 64], strides = [1, 1]} : vector<2x192xf32> to vector<2x64xf32>
    %105 = vector.broadcast %8 : vector<1x64xf32> to vector<2x64xf32>
    %106 = arith.addf %104, %105 : vector<2x64xf32>
    %107 = arith.mulf %101, %106 : vector<2x64xf32>
    %108 = arith.addf %103, %107 : vector<2x64xf32>
    %109 = math.tanh %108 : vector<2x64xf32>
    %110 = arith.subf %85, %109 : vector<2x64xf32>
    %111 = arith.mulf %102, %110 : vector<2x64xf32>
    %112 = arith.addf %109, %111 : vector<2x64xf32>
    %cst_37 = arith.constant 0.000000e+00 : f32
    %113 = vector.broadcast %cst_37 : f32 to vector<2x64xf32>
    %114 = arith.maximumf %112, %113 : vector<2x64xf32>
    %c3 = arith.constant 3 : index
    %c0_38 = arith.constant 0 : index
    %c0_39 = arith.constant 0 : index
    %115 = vector.load %arg7[%c3, %c0_38, %c0_39] : memref<8x2x64xf32, #tpu.memory_space<vmem>>, vector<1x2x64xf32>
    %116 = vector.shape_cast %115 : vector<1x2x64xf32> to vector<2x64xf32>
    %117 = vector.shape_cast %114 : vector<2x64xf32> to vector<1x2x64xf32>
    tpu.vector_store %arg7[%c3, %c0_38, %c0_39], %117 {strides = array<i32>} : memref<8x2x64xf32, #tpu.memory_space<vmem>>, vector<1x2x64xf32>,
    %c8 = arith.constant 8 : index
    %c0_40 = arith.constant 0 : index
    %118 = vector.load %arg8[%c8, %c0_40] : memref<16x192xf32, #tpu.memory_space<vmem>>, vector<2x192xf32>
    %cst_41 = arith.constant dense<0.000000e+00> : vector<2x192xf32>
    %119 = tpu.matmul %112, %7, %cst_41 {dimension_numbers = #tpu.dot_dimension_numbers<[1], [0], [0], [1], [0, 0, 1, 1], [], []>} : vector<2x64xf32>, vector<64x192xf32>, vector<2x192xf32> -> vector<2x192xf32>
    %120 = vector.extract_strided_slice %118 {offsets = [0, 0], sizes = [2, 128], strides = [1, 1]} : vector<2x192xf32> to vector<2x128xf32>
    %121 = vector.extract_strided_slice %119 {offsets = [0, 0], sizes = [2, 128], strides = [1, 1]} : vector<2x192xf32> to vector<2x128xf32>
    %122 = arith.addf %120, %121 : vector<2x128xf32>
    %123 = arith.negf %122 : vector<2x128xf32>
    %124 = math.exp %123 : vector<2x128xf32>
    %cst_42 = arith.constant 1.000000e+00 : f32
    %125 = vector.broadcast %cst_42 : f32 to vector<2x128xf32>
    %126 = arith.addf %125, %124 : vector<2x128xf32>
    %127 = arith.divf %125, %126 : vector<2x128xf32>
    %128 = vector.extract_strided_slice %127 {offsets = [0, 0], sizes = [2, 64], strides = [1, 1]} : vector<2x128xf32> to vector<2x64xf32>
    %129 = vector.extract_strided_slice %127 {offsets = [0, 64], sizes = [2, 64], strides = [1, 1]} : vector<2x128xf32> to vector<2x64xf32>
    %130 = vector.extract_strided_slice %118 {offsets = [0, 128], sizes = [2, 64], strides = [1, 1]} : vector<2x192xf32> to vector<2x64xf32>
    %131 = vector.extract_strided_slice %119 {offsets = [0, 128], sizes = [2, 64], strides = [1, 1]} : vector<2x192xf32> to vector<2x64xf32>
    %132 = vector.broadcast %8 : vector<1x64xf32> to vector<2x64xf32>
    %133 = arith.addf %131, %132 : vector<2x64xf32>
    %134 = arith.mulf %128, %133 : vector<2x64xf32>
    %135 = arith.addf %130, %134 : vector<2x64xf32>
    %136 = math.tanh %135 : vector<2x64xf32>
    %137 = arith.subf %112, %136 : vector<2x64xf32>
    %138 = arith.mulf %129, %137 : vector<2x64xf32>
    %139 = arith.addf %136, %138 : vector<2x64xf32>
    %cst_43 = arith.constant 0.000000e+00 : f32
    %140 = vector.broadcast %cst_43 : f32 to vector<2x64xf32>
    %141 = arith.maximumf %139, %140 : vector<2x64xf32>
    %c4_44 = arith.constant 4 : index
    %c0_45 = arith.constant 0 : index
    %c0_46 = arith.constant 0 : index
    %142 = vector.load %arg7[%c4_44, %c0_45, %c0_46] : memref<8x2x64xf32, #tpu.memory_space<vmem>>, vector<1x2x64xf32>
    %143 = vector.shape_cast %142 : vector<1x2x64xf32> to vector<2x64xf32>
    %144 = vector.shape_cast %141 : vector<2x64xf32> to vector<1x2x64xf32>
    tpu.vector_store %arg7[%c4_44, %c0_45, %c0_46], %144 {strides = array<i32>} : memref<8x2x64xf32, #tpu.memory_space<vmem>>, vector<1x2x64xf32>,
    %c10 = arith.constant 10 : index
    %c0_47 = arith.constant 0 : index
    %145 = vector.load %arg8[%c10, %c0_47] : memref<16x192xf32, #tpu.memory_space<vmem>>, vector<2x192xf32>
    %cst_48 = arith.constant dense<0.000000e+00> : vector<2x192xf32>
    %146 = tpu.matmul %139, %7, %cst_48 {dimension_numbers = #tpu.dot_dimension_numbers<[1], [0], [0], [1], [0, 0, 1, 1], [], []>} : vector<2x64xf32>, vector<64x192xf32>, vector<2x192xf32> -> vector<2x192xf32>
    %147 = vector.extract_strided_slice %145 {offsets = [0, 0], sizes = [2, 128], strides = [1, 1]} : vector<2x192xf32> to vector<2x128xf32>
    %148 = vector.extract_strided_slice %146 {offsets = [0, 0], sizes = [2, 128], strides = [1, 1]} : vector<2x192xf32> to vector<2x128xf32>
    %149 = arith.addf %147, %148 : vector<2x128xf32>
    %150 = arith.negf %149 : vector<2x128xf32>
    %151 = math.exp %150 : vector<2x128xf32>
    %cst_49 = arith.constant 1.000000e+00 : f32
    %152 = vector.broadcast %cst_49 : f32 to vector<2x128xf32>
    %153 = arith.addf %152, %151 : vector<2x128xf32>
    %154 = arith.divf %152, %153 : vector<2x128xf32>
    %155 = vector.extract_strided_slice %154 {offsets = [0, 0], sizes = [2, 64], strides = [1, 1]} : vector<2x128xf32> to vector<2x64xf32>
    %156 = vector.extract_strided_slice %154 {offsets = [0, 64], sizes = [2, 64], strides = [1, 1]} : vector<2x128xf32> to vector<2x64xf32>
    %157 = vector.extract_strided_slice %145 {offsets = [0, 128], sizes = [2, 64], strides = [1, 1]} : vector<2x192xf32> to vector<2x64xf32>
    %158 = vector.extract_strided_slice %146 {offsets = [0, 128], sizes = [2, 64], strides = [1, 1]} : vector<2x192xf32> to vector<2x64xf32>
    %159 = vector.broadcast %8 : vector<1x64xf32> to vector<2x64xf32>
    %160 = arith.addf %158, %159 : vector<2x64xf32>
    %161 = arith.mulf %155, %160 : vector<2x64xf32>
    %162 = arith.addf %157, %161 : vector<2x64xf32>
    %163 = math.tanh %162 : vector<2x64xf32>
    %164 = arith.subf %139, %163 : vector<2x64xf32>
    %165 = arith.mulf %156, %164 : vector<2x64xf32>
    %166 = arith.addf %163, %165 : vector<2x64xf32>
    %cst_50 = arith.constant 0.000000e+00 : f32
    %167 = vector.broadcast %cst_50 : f32 to vector<2x64xf32>
    %168 = arith.maximumf %166, %167 : vector<2x64xf32>
    %c5 = arith.constant 5 : index
    %c0_51 = arith.constant 0 : index
    %c0_52 = arith.constant 0 : index
    %169 = vector.load %arg7[%c5, %c0_51, %c0_52] : memref<8x2x64xf32, #tpu.memory_space<vmem>>, vector<1x2x64xf32>
    %170 = vector.shape_cast %169 : vector<1x2x64xf32> to vector<2x64xf32>
    %171 = vector.shape_cast %168 : vector<2x64xf32> to vector<1x2x64xf32>
    tpu.vector_store %arg7[%c5, %c0_51, %c0_52], %171 {strides = array<i32>} : memref<8x2x64xf32, #tpu.memory_space<vmem>>, vector<1x2x64xf32>,
    %c12 = arith.constant 12 : index
    %c0_53 = arith.constant 0 : index
    %172 = vector.load %arg8[%c12, %c0_53] : memref<16x192xf32, #tpu.memory_space<vmem>>, vector<2x192xf32>
    %cst_54 = arith.constant dense<0.000000e+00> : vector<2x192xf32>
    %173 = tpu.matmul %166, %7, %cst_54 {dimension_numbers = #tpu.dot_dimension_numbers<[1], [0], [0], [1], [0, 0, 1, 1], [], []>} : vector<2x64xf32>, vector<64x192xf32>, vector<2x192xf32> -> vector<2x192xf32>
    %174 = vector.extract_strided_slice %172 {offsets = [0, 0], sizes = [2, 128], strides = [1, 1]} : vector<2x192xf32> to vector<2x128xf32>
    %175 = vector.extract_strided_slice %173 {offsets = [0, 0], sizes = [2, 128], strides = [1, 1]} : vector<2x192xf32> to vector<2x128xf32>
    %176 = arith.addf %174, %175 : vector<2x128xf32>
    %177 = arith.negf %176 : vector<2x128xf32>
    %178 = math.exp %177 : vector<2x128xf32>
    %cst_55 = arith.constant 1.000000e+00 : f32
    %179 = vector.broadcast %cst_55 : f32 to vector<2x128xf32>
    %180 = arith.addf %179, %178 : vector<2x128xf32>
    %181 = arith.divf %179, %180 : vector<2x128xf32>
    %182 = vector.extract_strided_slice %181 {offsets = [0, 0], sizes = [2, 64], strides = [1, 1]} : vector<2x128xf32> to vector<2x64xf32>
    %183 = vector.extract_strided_slice %181 {offsets = [0, 64], sizes = [2, 64], strides = [1, 1]} : vector<2x128xf32> to vector<2x64xf32>
    %184 = vector.extract_strided_slice %172 {offsets = [0, 128], sizes = [2, 64], strides = [1, 1]} : vector<2x192xf32> to vector<2x64xf32>
    %185 = vector.extract_strided_slice %173 {offsets = [0, 128], sizes = [2, 64], strides = [1, 1]} : vector<2x192xf32> to vector<2x64xf32>
    %186 = vector.broadcast %8 : vector<1x64xf32> to vector<2x64xf32>
    %187 = arith.addf %185, %186 : vector<2x64xf32>
    %188 = arith.mulf %182, %187 : vector<2x64xf32>
    %189 = arith.addf %184, %188 : vector<2x64xf32>
    %190 = math.tanh %189 : vector<2x64xf32>
    %191 = arith.subf %166, %190 : vector<2x64xf32>
    %192 = arith.mulf %183, %191 : vector<2x64xf32>
    %193 = arith.addf %190, %192 : vector<2x64xf32>
    %cst_56 = arith.constant 0.000000e+00 : f32
    %194 = vector.broadcast %cst_56 : f32 to vector<2x64xf32>
    %195 = arith.maximumf %193, %194 : vector<2x64xf32>
    %c6_57 = arith.constant 6 : index
    %c0_58 = arith.constant 0 : index
    %c0_59 = arith.constant 0 : index
    %196 = vector.load %arg7[%c6_57, %c0_58, %c0_59] : memref<8x2x64xf32, #tpu.memory_space<vmem>>, vector<1x2x64xf32>
    %197 = vector.shape_cast %196 : vector<1x2x64xf32> to vector<2x64xf32>
    %198 = vector.shape_cast %195 : vector<2x64xf32> to vector<1x2x64xf32>
    tpu.vector_store %arg7[%c6_57, %c0_58, %c0_59], %198 {strides = array<i32>} : memref<8x2x64xf32, #tpu.memory_space<vmem>>, vector<1x2x64xf32>,
    %c14 = arith.constant 14 : index
    %c0_60 = arith.constant 0 : index
    %199 = vector.load %arg8[%c14, %c0_60] : memref<16x192xf32, #tpu.memory_space<vmem>>, vector<2x192xf32>
    %cst_61 = arith.constant dense<0.000000e+00> : vector<2x192xf32>
    %200 = tpu.matmul %193, %7, %cst_61 {dimension_numbers = #tpu.dot_dimension_numbers<[1], [0], [0], [1], [0, 0, 1, 1], [], []>} : vector<2x64xf32>, vector<64x192xf32>, vector<2x192xf32> -> vector<2x192xf32>
    %201 = vector.extract_strided_slice %199 {offsets = [0, 0], sizes = [2, 128], strides = [1, 1]} : vector<2x192xf32> to vector<2x128xf32>
    %202 = vector.extract_strided_slice %200 {offsets = [0, 0], sizes = [2, 128], strides = [1, 1]} : vector<2x192xf32> to vector<2x128xf32>
    %203 = arith.addf %201, %202 : vector<2x128xf32>
    %204 = arith.negf %203 : vector<2x128xf32>
    %205 = math.exp %204 : vector<2x128xf32>
    %cst_62 = arith.constant 1.000000e+00 : f32
    %206 = vector.broadcast %cst_62 : f32 to vector<2x128xf32>
    %207 = arith.addf %206, %205 : vector<2x128xf32>
    %208 = arith.divf %206, %207 : vector<2x128xf32>
    %209 = vector.extract_strided_slice %208 {offsets = [0, 0], sizes = [2, 64], strides = [1, 1]} : vector<2x128xf32> to vector<2x64xf32>
    %210 = vector.extract_strided_slice %208 {offsets = [0, 64], sizes = [2, 64], strides = [1, 1]} : vector<2x128xf32> to vector<2x64xf32>
    %211 = vector.extract_strided_slice %199 {offsets = [0, 128], sizes = [2, 64], strides = [1, 1]} : vector<2x192xf32> to vector<2x64xf32>
    %212 = vector.extract_strided_slice %200 {offsets = [0, 128], sizes = [2, 64], strides = [1, 1]} : vector<2x192xf32> to vector<2x64xf32>
    %213 = vector.broadcast %8 : vector<1x64xf32> to vector<2x64xf32>
    %214 = arith.addf %212, %213 : vector<2x64xf32>
    %215 = arith.mulf %209, %214 : vector<2x64xf32>
    %216 = arith.addf %211, %215 : vector<2x64xf32>
    %217 = math.tanh %216 : vector<2x64xf32>
    %218 = arith.subf %193, %217 : vector<2x64xf32>
    %219 = arith.mulf %210, %218 : vector<2x64xf32>
    %220 = arith.addf %217, %219 : vector<2x64xf32>
    %cst_63 = arith.constant 0.000000e+00 : f32
    %221 = vector.broadcast %cst_63 : f32 to vector<2x64xf32>
    %222 = arith.maximumf %220, %221 : vector<2x64xf32>
    %c7 = arith.constant 7 : index
    %c0_64 = arith.constant 0 : index
    %c0_65 = arith.constant 0 : index
    %223 = vector.load %arg7[%c7, %c0_64, %c0_65] : memref<8x2x64xf32, #tpu.memory_space<vmem>>, vector<1x2x64xf32>
    %224 = vector.shape_cast %223 : vector<1x2x64xf32> to vector<2x64xf32>
    %225 = vector.shape_cast %222 : vector<2x64xf32> to vector<1x2x64xf32>
    tpu.vector_store %arg7[%c7, %c0_64, %c0_65], %225 {strides = array<i32>} : memref<8x2x64xf32, #tpu.memory_space<vmem>>, vector<1x2x64xf32>,
    return
  }
  func.func @transform_0(%arg0: i32) -> (i32, i32) {
    %c0_i32 = arith.constant 0 : i32
    %c0_i32_0 = arith.constant 0 : i32
    %c0_i32_1 = arith.constant 0 : i32
    return %c0_i32, %c0_i32_0 : i32, i32
  }
  func.func @transform_1(%arg0: i32) -> (i32, i32) {
    %c0_i32 = arith.constant 0 : i32
    %c0_i32_0 = arith.constant 0 : i32
    %c0_i32_1 = arith.constant 0 : i32
    return %c0_i32, %c0_i32_0 : i32, i32
  }
  func.func @transform_2(%arg0: i32) -> (i32, i32) {
    %c0_i32 = arith.constant 0 : i32
    %c0_i32_0 = arith.constant 0 : i32
    %c0_i32_1 = arith.constant 0 : i32
    return %c0_i32, %c0_i32_0 : i32, i32
  }
  func.func @transform_3(%arg0: i32) -> (i32, i32) {
    %c0_i32 = arith.constant 0 : i32
    %c0_i32_0 = arith.constant 0 : i32
    %c0_i32_1 = arith.constant 0 : i32
    return %c0_i32, %c0_i32_0 : i32, i32
  }
  func.func @transform_4(%arg0: i32) -> (i32, i32) {
    %c0_i32 = arith.constant 0 : i32
    %c0_i32_0 = arith.constant 0 : i32
    %c0_i32_1 = arith.constant 0 : i32
    return %c0_i32, %c0_i32_0 : i32, i32
  }
  func.func @transform_5(%arg0: i32) -> (i32, i32) {
    %c0_i32 = arith.constant 0 : i32
    %c0_i32_0 = arith.constant 0 : i32
    %c0_i32_1 = arith.constant 0 : i32
    return %c0_i32, %c0_i32_0 : i32, i32
  }
  func.func @transform_6(%arg0: i32) -> (i32, i32, i32) {
    %c0_i32 = arith.constant 0 : i32
    %c0_i32_0 = arith.constant 0 : i32
    %c0_i32_1 = arith.constant 0 : i32
    %c0_i32_2 = arith.constant 0 : i32
    return %c0_i32, %c0_i32_0, %c0_i32_1 : i32, i32, i32
  }
}

</mosaic_0001>

<bundles_post_ra>
// kernel: tpu_custom_call.1
= control target key start
LH: loop header
LB: loop body
LE: loop exit
PB: predicated region body
PF: predicated region fallthrough
CT: control target
= control target key end

     0   :  { %11 = vsyncpa [#allocation4], 0  ;;  %s1548_s0 = inlined_call_operand.vmem [shape: f32[16,7], index: 0, kind: input, shape index: {}]   ;;  %s1549_s1 = inlined_call_operand.vmem [shape: f32[2,64], index: 1, kind: input, shape index: {}]   ;;  %s1550_s2 = inlined_call_operand.vmem [shape: f32[7,192], index: 2, kind: input, shape index: {}]   ;;  %s1551_s3 = inlined_call_operand.hbm [shape: f32[64,192], index: 3, kind: input, shape index: {}]   ;;  %s1552_s4 = inlined_call_operand.vmem [shape: f32[1,192], index: 4, kind: input, shape index: {}]   ;;  %s1553_s5 = inlined_call_operand.vmem [shape: f32[1,64], index: 5, kind: input, shape index: {}]   ;;  %s1554_s6 = inlined_call_operand.hbm [shape: f32[8,2,64], index: 6, kind: output, shape index: {}]  }
   0x1   :  { %12 = vsyncpa [#allocation5], 0  ;;  %s1324_s21 = smov [#allocation3]   ;;  %s1276_s25 = scalar_lea.hbm %s1551_s3, 2048 }
   0x2   :  { %s24_s22 = sshll.u32 %s1324_s21, 4  ;;  %p1277_p0 = scmp.ne.s32.totalorder %s1551_s3, %s1276_s25  ;;  %s25_s22 = int_to_ptr.vmem [resolvable:$true] %s24_s22 }
   0x3   :  { %p1280_p1 = scmp.lt.u32.totalorder %s1276_s25, %s1551_s3 }
   0x5   :  { %p1282_p2 = pnand %p1280_p1, %p1277_p0 }
   0x7   :  { %1285 = shalt.err (!%p1282_p2)
}
   0x8   :  { %s1286_s30 = scalar_lea.vmem %s25_s22, 2048  ;;  %p1291_p4 = scmp.lt.s32.totalorder %s25_s22, %s25_s22 }
   0x9   :  { %p1287_p3 = scmp.ne.s32.totalorder %s25_s22, %s1286_s30  ;;  %p1292_p5 = scmp.lt.s32.totalorder %s1286_s30, %s1286_s30 }
   0xb   :  { %p1293_p6 = por %p1292_p5, %p1291_p4 }
   0xd   :  { %p1294_p7 = pnand %p1293_p6, %p1287_p3 }
   0xf   :  { %1297 = shalt.err (!%p1294_p7)
}
  0x10   :  { %s1325_s7 = smov 256   ;;  %s1326_s8 = smov 16  }
  0x11   :  { %30 = dma.hbm_to_vmem [thread:$0]  %s1551_s3, 2048, %s25_s22, [#allocation4], %s1325_s7, %s1325_s7, %s1326_s8  }
  0x12   :  { %1320 = dma.done.wait [#allocation4], 2048  }
  0x13   :  { %1321 = vsyncadd [#allocation4], 4294965248  ;;  %v1327_v0 = vmov 0.0   ;;  %vm61_vm0 = vcmask 1046528   ;;  %v151_v1 = vld [vmem:[#allocation3 + $0x8] sm:$0xff]  ;;  %v153_v2 = vld [vmem:[#allocation3 + $0x18] sm:$0xff]  ;;  %v44_v29 = vlaneseq }
  0x14   :  { %132 = vmatprep.mubr.f32.mxu0 %v1327_v0  ;;  %237 = vmatprep.mubr.f32.mxu1 %v1327_v0  ;;  %v150_v3 = vld [vmem:[#allocation3] sm:$0xff]  ;;  %v1381_v4 = vpack.c.bf16 %v153_v2, %v151_v1  ;;  %v152_v5 = vld [vmem:[#allocation3 + $0x10] sm:$0xff]  ;;  %v41_v6 = vld [vmem:[%s1550_s2 + $0x8] sm:$0x7f]  ;;  %vm54_vm1 = vcmask 56320   ;;  %vm146_vm2 = vcmask 523264  }
  0x15   :  { %v40_v7 = vld [vmem:[%s1550_s2] sm:$0x7f]  ;;  %v1389_v8 = vpack.c.bf16 %v152_v5, %v150_v3  ;;  %1071 = vmatprep.subr.msk.mxu0 %vm61_vm0, %v41_v6  ;;  %v155_v9 = vld [vmem:[#allocation3 + $0x28] sm:$0xff]  ;;  %v157_v10 = vld [vmem:[#allocation3 + $0x38] sm:$0xff]  ;;  %v45_v30 = vshrl.u32 %v44_v29, 7  ;;  %s1328_s21 = smov 64  }
  0x16   :  { %v38_v11 = vld [vmem:[%s1548_s0] sm:$0xff]  ;;  %1093 = vmatprep.subr.bf16.mxu1 %v1381_v4  ;;  %1072 = vmatpush1.msk.msra.mxu0 %vm61_vm0, %v40_v7  ;;  %v1395_v12 = vpack.c.bf16 %v157_v10, %v155_v9  ;;  %v154_v13 = vld [vmem:[#allocation3 + $0x20] sm:$0xff]  ;;  %v159_v15 = vld [vmem:[#allocation3 + $0x48] sm:$0xff]  ;;  %vm273_vm3 = vcmask 517120   ;;  %vm385_vm4 = vcmask 519170   ;;  %vm498_vm5 = vcmask 521220  }
  0x17   :  { %v156_v14 = vld [vmem:[#allocation3 + $0x30] sm:$0xff]  ;;  %1095 = vmatpush1.bf16.msra.mxu1 %v1389_v8  ;;  %1073 = vmatmul.mubr.msk.f32.vlgmr.msra.gmra.mrb[0].mxu0 %vm54_vm1, %v38_v11  ;;  %v161_v17 = vld [vmem:[#allocation3 + $0x58] sm:$0xff]  ;;  %v158_v19 = vld [vmem:[#allocation3 + $0x40] sm:$0xff]  ;;  %v46_v31 = vsub.s32 0, %v45_v30  ;;  %v50_v33 = vsub.s32 1, %v45_v30  ;;  %vm611_vm6 = vcmask 523270  }
  0x18   :  { %v1399_v16 = vpack.c.bf16 %v156_v14, %v154_v13  ;;  %1097 = vmatprep.subr.bf16.mxu1 %v1395_v12  ;;  %v1402_v18 = vpack.c.bf16 %v161_v17, %v159_v15  ;;  %v160_v20 = vld [vmem:[#allocation3 + $0x50] sm:$0xff]  ;;  %1109 = vmatprep.subr.bf16.mxu0 %v1381_v4  ;;  %v163_v21 = vld [vmem:[#allocation3 + $0x68] sm:$0xff]  ;;  %v165_v22 = vld [vmem:[#allocation3 + $0x78] sm:$0xff] }
  0x19   :  { %1111 = vmatpush1.bf16.msra.mxu0 %v1389_v8  ;;  %138 = vmatprep.mubr.f32.mxu0 %v1327_v0  ;;  %v1409_v23 = vpack.c.bf16 %v160_v20, %v158_v19  ;;  %v1412_v24 = vpack.c.bf16 %v165_v22, %v163_v21  ;;  %v162_v25 = vld [vmem:[#allocation3 + $0x60] sm:$0xff]  ;;  %v164_v26 = vld [vmem:[#allocation3 + $0x70] sm:$0xff]  ;;  %v39_v53 = vld [vmem:[%s1548_s0 + $0x8] sm:$0xff]  ;;  %s1329_s0 = smov [#allocation6]  }
  0x1a   :  { %1113 = vmatprep.subr.bf16.mxu0 %v1395_v12  ;;  %v1417_v27 = vpack.c.bf16 %v164_v26, %v162_v25  ;;  %v167_v28 = vld [vmem:[%s1549_s1] sm:$0x3] }
  0x1b   :  { %1099 = vmatpush1.bf16.msra.mxu1 %v1399_v16  ;;  %v42_v32 = vld [vmem:[%s1552_s4] sm:$0x3]  ;;  %1074 = vmatmul.mubr.msk.f32.gmra.mrb[2].mxu0 %vm54_vm1, %v39_v53 }
  0x1c   :  { %1101 = vmatprep.subr.bf16.mxu1 %v1402_v18  ;;  %v47_v34 = vrot.slane %v42_v32, %v46_v31  ;;  %v51_v35 = vrot.slane %v42_v32, %v50_v33  ;;  %v1446_v47 = vld [vmem:[%s1553_s5] ss:$0 sm:$0xff]  ;;  %344 = vmatprep.mubr.f32.mxu0 %v1327_v0  ;;  %s1059_s5 = sshll.u32 %s1329_s0, 4  ;;  %s1060_s5 = int_to_ptr.vmem [resolvable:$true] %s1059_s5 }
  0x1d   :  { %1115 = vmatpush1.bf16.msra.mxu0 %v1399_v16  ;;  %s1298_s22 = scalar_lea.vmem %s1060_s5, 256  ;;  %p1303_p9 = scmp.lt.s32.totalorder %s1060_s5, %s1060_s5 }
  0x1e   :  { %1117 = vmatprep.subr.bf16.mxu0 %v1402_v18  ;;  %p1299_p8 = scmp.ne.s32.totalorder %s1060_s5, %s1298_s22  ;;  %p1304_p10 = scmp.lt.s32.totalorder %s1298_s22, %s1298_s22 }
  0x1f   :  { %1103 = vmatpush1.bf16.msra.mxu1 %v1409_v23 }
  0x20   :  { %1105 = vmatprep.subr.bf16.mxu1 %v1412_v24  ;;  %p1305_p11 = por %p1304_p10, %p1303_p9 }
  0x21   :  { %1119 = vmatpush1.bf16.msra.mxu0 %v1409_v23 }
  0x22   :  { %1121 = vmatprep.subr.bf16.mxu0 %v1412_v24  ;;  %p1306_p12 = pnand %p1305_p11, %p1299_p8 }
  0x23   :  { %1107 = vmatpush1.bf16.msra.mxu1 %v1417_v27 }
  0x24   :  { %1125 = vmatprep.subr.bf16.mxu1 %v1381_v4 }
  0x25   :  { %1123 = vmatpush1.bf16.msra.mxu0 %v1417_v27 }
  0x26   :  { %1075 = vmatmul.mubr.msk.f32.vlgmr.msra.gmra.mrb[0].mxu1 %vm146_vm2, %v167_v28  ;;  %1141 = vmatprep.subr.bf16.mxu0 %v1381_v4 }
  0x27   :  { %1127 = vmatpush1.bf16.msra.mxu1 %v1389_v8  ;;  %457 = vmatprep.mubr.f32.mxu1 %v1327_v0 }
  0x28   :  { %1129 = vmatprep.subr.bf16.mxu1 %v1395_v12 }
  0x2b   :  { %1131 = vmatpush1.bf16.msra.mxu1 %v1399_v16 }
  0x2c   :  { %1133 = vmatprep.subr.bf16.mxu1 %v1402_v18 }
  0x2f   :  { %1135 = vmatpush1.bf16.msra.mxu1 %v1409_v23 }
  0x30   :  { %1137 = vmatprep.subr.bf16.mxu1 %v1412_v24 }
  0x33   :  { %1139 = vmatpush1.bf16.msra.mxu1 %v1417_v27 }
  0x34   :  { %1157 = vmatprep.subr.bf16.mxu1 %v1381_v4 }
  0xea   :  { %v134_v36 = vpop.f32.mrb[0].mxu0 }
  0xeb   :  { %v135_v37 = vadd.f32 %v134_v36, %v47_v34  ;;  %v136_v38 = vpop.f32.mrb[1].mxu0 }
  0xec   :  { %v137_v39 = vadd.f32 %v136_v38, %v51_v35 }
  0xed   :  { %145 = vst [vmem:[#allocation2] sm:$0xff] %v135_v37 }
  0xee   :  { %147 = vst.msk [vmem:[#allocation2 + $0x8] sm:$0xff] %vm146_vm2, %v137_v39  ;;  %v140_v58 = vpop.f32.mrb[2].mxu0 }
  0xef   :  { %v141_v59 = vadd.f32 %v140_v58, %v47_v34  ;;  %v142_v60 = vpop.f32.mrb[3].mxu0 }
  0xf0   :  { %v143_v61 = vadd.f32 %v142_v60, %v51_v35 }
  0xf1   :  { %148 = vst [vmem:[#allocation2 + $0x10] sm:$0xff] %v141_v59 }
  0xf2   :  { %149 = vst.msk [vmem:[#allocation2 + $0x18] sm:$0xff] %vm146_vm2, %v143_v61 }
  0xf4   :  { %v168_v40 = vld [vmem:[#allocation2] sm:$0x3]  ;;  %v275_v6 = vld [vmem:[#allocation2] sm:$0xc]  ;;  %v387_v37 = vld [vmem:[#allocation2] sm:$0x30] }
  0xf5   :  { %v169_v51 = vld [vmem:[#allocation2 + $0x8] sm:$0x3]  ;;  %v276_v19 = vld [vmem:[#allocation2 + $0x8] sm:$0xc] }
  0xf9   :  { %v239_v41 = vpop.f32.mrb[0].mxu1 }
  0xfa   :  { %v244_v42 = vadd.f32 %v239_v41, %v168_v40  ;;  %v241_v43 = vpop.f32.mrb[1].mxu1 }
  0xfb   :  { %v257_v48 = vadd.f32 %v1446_v47, %v241_v43 }
  0xfc   :  { %v1076_v44 = vmul.f32 -1.442695, %v244_v42 }
  0xfe   :  { %1228 = vpow2.f32 %v1076_v44 }
 0x108   :  { %v1229_v45 = vpop.eup %1228 }
 0x109   :  { %v248_v46 = vadd.f32 1.0, %v1229_v45 }
 0x10b   :  { %1230 = vrcp.f32 %v248_v46  ;;  %v388_v46 = vld [vmem:[#allocation2 + $0x8] sm:$0x30] }
 0x115   :  { %v1231_v49 = vpop.eup %1230 }
 0x116   :  { %v258_v50 = vmul.f32 %v1231_v49, %v257_v48 }
 0x118   :  { %v259_v52 = vadd.f32 %v258_v50, %v169_v51 }
 0x11a   :  { %1232 = vtanh.f32 %v259_v52 }
 0x124   :  { %v1233_v54 = vpop.eup %1232 }
 0x125   :  { %v261_v55 = vsub.f32 %v167_v28, %v1233_v54 }
 0x127   :  { %263 = vrot.lane.b32.xlu0 %v261_v55, %s1328_s21 }
 0x199   :  { %v264_v56 = vpop.permute.xlu0 %263 }
 0x19a   :  { %v266_v57 = vmul.f32 %v1231_v49, %v264_v56 }
 0x19c   :  { %268 = vrot.lane.b32.xlu0 %v266_v57, %s1328_s21 }
 0x20e   :  { %v269_v62 = vpop.permute.xlu0 %268 }
 0x20f   :  { %v271_v63 = vadd.f32 %v1233_v54, %v269_v62  ;;  %v500_v62 = vld [vmem:[#allocation2] sm:$0xc0] }
 0x211   :  { %v272_v1 = vmax.f32 %v271_v63, 0.0  ;;  %1078 = vmatmul.mubr.msk.f32.vlgmr.msra.gmra.mrb[4].mxu0 %vm146_vm2, %v271_v63 }
 0x212   :  { %1143 = vmatpush1.bf16.msra.mxu0 %v1389_v8  ;;  %570 = vmatprep.mubr.f32.mxu0 %v1327_v0 }
 0x213   :  { %274 = vst.msk [vmem:[#allocation6] sm:$0x3] %vm273_vm3, %v272_v1  ;;  %1145 = vmatprep.subr.bf16.mxu0 %v1395_v12 }
 0x216   :  { %1147 = vmatpush1.bf16.msra.mxu0 %v1399_v16 }
 0x217   :  { %1149 = vmatprep.subr.bf16.mxu0 %v1402_v18 }
 0x21a   :  { %1151 = vmatpush1.bf16.msra.mxu0 %v1409_v23 }
 0x21b   :  { %1153 = vmatprep.subr.bf16.mxu0 %v1412_v24 }
 0x21e   :  { %1155 = vmatpush1.bf16.msra.mxu0 %v1417_v27 }
 0x21f   :  { %1173 = vmatprep.subr.bf16.mxu0 %v1381_v4 }
 0x2e4   :  { %v346_v2 = vpop.f32.mrb[4].mxu0 }
 0x2e5   :  { %v352_v3 = vrot.slane %v346_v2, 6  ;;  %v348_v5 = vpop.f32.mrb[5].mxu0 }
 0x2e6   :  { %v361_v13 = vadd.f32 %v1446_v47, %v348_v5 }
 0x2e7   :  { %v354_v7 = vadd.f32 %v352_v3, %v275_v6 }
 0x2e8   :  { %v363_v14 = vrot.slane %v361_v13, 6 }
 0x2e9   :  { %v1079_v9 = vmul.f32 -1.442695, %v354_v7 }
 0x2eb   :  { %1234 = vpow2.f32 %v1079_v9 }
 0x2f5   :  { %v1235_v10 = vpop.eup %1234 }
 0x2f6   :  { %v358_v11 = vadd.f32 1.0, %v1235_v10  ;;  %v501_v10 = vld [vmem:[#allocation2 + $0x8] sm:$0xc0] }
 0x2f8   :  { %1236 = vrcp.f32 %v358_v11 }
 0x302   :  { %v1237_v15 = vpop.eup %1236 }
 0x303   :  { %v365_v17 = vmul.f32 %v1237_v15, %v363_v14 }
 0x305   :  { %v366_v20 = vadd.f32 %v365_v17, %v276_v19 }
 0x307   :  { %1238 = vtanh.f32 %v366_v20 }
 0x311   :  { %v1239_v21 = vpop.eup %1238 }
 0x312   :  { %v369_v22 = vrot.slane %v1239_v21, 2 }
 0x314   :  { %v371_v25 = vsub.f32 %v271_v63, %v369_v22 }
 0x316   :  { %v373_v26 = vrot.slane %v371_v25, 6 }
 0x318   :  { %374 = vrot.lane.b32.xlu1 %v373_v26, %s1328_s21  ;;  %v613_v26 = vld [vmem:[#allocation2 + $0x10] sm:$0x3] }
 0x38a   :  { %v375_v28 = vpop.permute.xlu1 %374 }
 0x38b   :  { %v377_v29 = vmul.f32 %v1237_v15, %v375_v28 }
 0x38d   :  { %379 = vrot.lane.b32.xlu1 %v377_v29, %s1328_s21 }
 0x3ff   :  { %v380_v30 = vpop.permute.xlu1 %379 }
 0x400   :  { %v382_v31 = vadd.f32 %v1239_v21, %v380_v30 }
 0x402   :  { %v383_v32 = vmax.f32 %v382_v31, 0.0  ;;  %v390_v33 = vrot.slane %v382_v31, 2 }
 0x404   :  { %386 = vst.msk [vmem:[#allocation6] sm:$0xc] %vm385_vm4, %v383_v32  ;;  %1080 = vmatmul.mubr.msk.f32.vlgmr.msra.gmra.mrb[2].mxu1 %vm146_vm2, %v390_v33 }
 0x405   :  { %1159 = vmatpush1.bf16.msra.mxu1 %v1389_v8  ;;  %683 = vmatprep.mubr.f32.mxu1 %v1327_v0 }
 0x406   :  { %1161 = vmatprep.subr.bf16.mxu1 %v1395_v12 }
 0x409   :  { %1163 = vmatpush1.bf16.msra.mxu1 %v1399_v16 }
 0x40a   :  { %1165 = vmatprep.subr.bf16.mxu1 %v1402_v18 }
 0x40d   :  { %1167 = vmatpush1.bf16.msra.mxu1 %v1409_v23 }
 0x40e   :  { %1169 = vmatprep.subr.bf16.mxu1 %v1412_v24 }
 0x411   :  { %1171 = vmatpush1.bf16.msra.mxu1 %v1417_v27 }
 0x412   :  { %1189 = vmatprep.subr.bf16.mxu1 %v1381_v4 }
 0x4d7   :  { %v459_v34 = vpop.f32.mrb[2].mxu1 }
 0x4d8   :  { %v465_v35 = vrot.slane %v459_v34, 4  ;;  %v461_v36 = vpop.f32.mrb[3].mxu1 }
 0x4d9   :  { %v474_v42 = vadd.f32 %v1446_v47, %v461_v36 }
 0x4da   :  { %v467_v38 = vadd.f32 %v465_v35, %v387_v37  ;;  %v614_v37 = vld [vmem:[#allocation2 + $0x18] sm:$0x3] }
 0x4db   :  { %v476_v43 = vrot.slane %v474_v42, 4 }
 0x4dc   :  { %v1081_v39 = vmul.f32 -1.442695, %v467_v38 }
 0x4de   :  { %1240 = vpow2.f32 %v1081_v39 }
 0x4e8   :  { %v1241_v40 = vpop.eup %1240 }
 0x4e9   :  { %v471_v41 = vadd.f32 1.0, %v1241_v40 }
 0x4eb   :  { %1242 = vrcp.f32 %v471_v41 }
 0x4f5   :  { %v1243_v44 = vpop.eup %1242 }
 0x4f6   :  { %v478_v45 = vmul.f32 %v1243_v44, %v476_v43 }
 0x4f8   :  { %v479_v48 = vadd.f32 %v478_v45, %v388_v46 }
 0x4fa   :  { %1244 = vtanh.f32 %v479_v48 }
 0x504   :  { %v1245_v49 = vpop.eup %1244 }
 0x505   :  { %v482_v50 = vrot.slane %v1245_v49, 2 }
 0x507   :  { %v484_v51 = vsub.f32 %v382_v31, %v482_v50 }
 0x509   :  { %v486_v52 = vrot.slane %v484_v51, 6 }
 0x50b   :  { %487 = vrot.lane.b32.xlu0 %v486_v52, %s1328_s21 }
 0x57d   :  { %v488_v53 = vpop.permute.xlu0 %487 }
 0x57e   :  { %v490_v54 = vmul.f32 %v1243_v44, %v488_v53 }
 0x580   :  { %492 = vrot.lane.b32.xlu1 %v490_v54, %s1328_s21 }
 0x5f2   :  { %v493_v55 = vpop.permute.xlu1 %492 }
 0x5f3   :  { %v495_v56 = vadd.f32 %v1245_v49, %v493_v55 }
 0x5f5   :  { %v496_v57 = vmax.f32 %v495_v56, 0.0  ;;  %v503_v58 = vrot.slane %v495_v56, 4 }
 0x5f7   :  { %499 = vst.msk [vmem:[#allocation6] sm:$0x30] %vm498_vm5, %v496_v57  ;;  %1082 = vmatmul.mubr.msk.f32.vlgmr.msra.gmra.mrb[6].mxu0 %vm146_vm2, %v503_v58 }
 0x5f8   :  { %1175 = vmatpush1.bf16.msra.mxu0 %v1389_v8  ;;  %788 = vmatprep.mubr.f32.mxu0 %v1327_v0 }
 0x5f9   :  { %1177 = vmatprep.subr.bf16.mxu0 %v1395_v12 }
 0x5fc   :  { %1179 = vmatpush1.bf16.msra.mxu0 %v1399_v16 }
 0x5fd   :  { %1181 = vmatprep.subr.bf16.mxu0 %v1402_v18 }
 0x600   :  { %1183 = vmatpush1.bf16.msra.mxu0 %v1409_v23 }
 0x601   :  { %1185 = vmatprep.subr.bf16.mxu0 %v1412_v24 }
 0x604   :  { %1187 = vmatpush1.bf16.msra.mxu0 %v1417_v27 }
 0x605   :  { %1205 = vmatprep.subr.bf16.mxu0 %v1381_v4 }
 0x6ca   :  { %v572_v59 = vpop.f32.mrb[6].mxu0 }
 0x6cb   :  { %v578_v60 = vrot.slane %v572_v59, 2  ;;  %v574_v61 = vpop.f32.mrb[7].mxu0 }
 0x6cc   :  { %v587_v5 = vadd.f32 %v1446_v47, %v574_v61 }
 0x6cd   :  { %v580_v63 = vadd.f32 %v578_v60, %v500_v62 }
 0x6ce   :  { %v589_v6 = vrot.slane %v587_v5, 2 }
 0x6cf   :  { %v1083_v1 = vmul.f32 -1.442695, %v580_v63 }
 0x6d1   :  { %1246 = vpow2.f32 %v1083_v1 }
 0x6db   :  { %v1247_v2 = vpop.eup %1246 }
 0x6dc   :  { %v584_v3 = vadd.f32 1.0, %v1247_v2 }
 0x6de   :  { %1248 = vrcp.f32 %v584_v3 }
 0x6e8   :  { %v1249_v7 = vpop.eup %1248 }
 0x6e9   :  { %v591_v9 = vmul.f32 %v1249_v7, %v589_v6  ;;  %v830_v6 = vld [vmem:[#allocation2 + $0x10] sm:$0x30] }
 0x6eb   :  { %v592_v11 = vadd.f32 %v591_v9, %v501_v10 }
 0x6ed   :  { %1250 = vtanh.f32 %v592_v11 }
 0x6f7   :  { %v1251_v13 = vpop.eup %1250 }
 0x6f8   :  { %v595_v4 = vrot.slane %v1251_v13, 2 }
 0x6fa   :  { %v597_v14 = vsub.f32 %v495_v56, %v595_v4 }
 0x6fc   :  { %v599_v15 = vrot.slane %v597_v14, 6 }
 0x6fe   :  { %600 = vrot.lane.b32.xlu0 %v599_v15, %s1328_s21 }
 0x770   :  { %v601_v17 = vpop.permute.xlu0 %600 }
 0x771   :  { %v603_v19 = vmul.f32 %v1249_v7, %v601_v17  ;;  %v831_v17 = vld [vmem:[#allocation2 + $0x18] sm:$0x30] }
 0x773   :  { %605 = vrot.lane.b32.xlu1 %v603_v19, %s1328_s21 }
 0x7e5   :  { %v606_v20 = vpop.permute.xlu1 %605 }
 0x7e6   :  { %v608_v21 = vadd.f32 %v1251_v13, %v606_v20 }
 0x7e8   :  { %v609_v22 = vmax.f32 %v608_v21, 0.0  ;;  %v616_v25 = vrot.slane %v608_v21, 6 }
 0x7ea   :  { %1084 = vmatmul.mubr.msk.f32.vlgmr.msra.gmra.mrb[4].mxu1 %vm146_vm2, %v616_v25  ;;  %612 = vst.msk [vmem:[#allocation6] sm:$0xc0] %vm611_vm6, %v609_v22 }
 0x7eb   :  { %1191 = vmatpush1.bf16.msra.mxu1 %v1389_v8  ;;  %900 = vmatprep.mubr.f32.mxu1 %v1327_v0 }
 0x7ec   :  { %1193 = vmatprep.subr.bf16.mxu1 %v1395_v12 }
 0x7ef   :  { %1195 = vmatpush1.bf16.msra.mxu1 %v1399_v16 }
 0x7f0   :  { %1197 = vmatprep.subr.bf16.mxu1 %v1402_v18 }
 0x7f3   :  { %1199 = vmatpush1.bf16.msra.mxu1 %v1409_v23 }
 0x7f4   :  { %1201 = vmatprep.subr.bf16.mxu1 %v1412_v24 }
 0x7f7   :  { %1203 = vmatpush1.bf16.msra.mxu1 %v1417_v27 }
 0x8bd   :  { %v685_v28 = vpop.f32.mrb[4].mxu1 }
 0x8be   :  { %v690_v29 = vadd.f32 %v685_v28, %v613_v26  ;;  %v687_v30 = vpop.f32.mrb[5].mxu1 }
 0x8bf   :  { %v697_v34 = vadd.f32 %v1446_v47, %v687_v30 }
 0x8c0   :  { %v1085_v31 = vmul.f32 -1.442695, %v690_v29 }
 0x8c2   :  { %1252 = vpow2.f32 %v1085_v31 }
 0x8cc   :  { %v1253_v32 = vpop.eup %1252 }
 0x8cd   :  { %v694_v33 = vadd.f32 1.0, %v1253_v32 }
 0x8cf   :  { %1254 = vrcp.f32 %v694_v33 }
 0x8d9   :  { %v1255_v35 = vpop.eup %1254 }
 0x8da   :  { %v698_v36 = vmul.f32 %v1255_v35, %v697_v34 }
 0x8dc   :  { %v699_v38 = vadd.f32 %v698_v36, %v614_v37  ;;  %v942_v36 = vld [vmem:[#allocation2 + $0x10] sm:$0xc0] }
 0x8de   :  { %1256 = vtanh.f32 %v699_v38 }
 0x8e8   :  { %v1257_v39 = vpop.eup %1256 }
 0x8e9   :  { %v702_v40 = vrot.slane %v1257_v39, 2 }
 0x8eb   :  { %v704_v41 = vsub.f32 %v608_v21, %v702_v40 }
 0x8ed   :  { %v706_v42 = vrot.slane %v704_v41, 6 }
 0x8ef   :  { %707 = vrot.lane.b32.xlu0 %v706_v42, %s1328_s21 }
 0x961   :  { %v708_v43 = vpop.permute.xlu0 %707 }
 0x962   :  { %v710_v44 = vmul.f32 %v1255_v35, %v708_v43 }
 0x964   :  { %712 = vrot.lane.b32.xlu1 %v710_v44, %s1328_s21 }
 0x9d6   :  { %v713_v45 = vpop.permute.xlu1 %712 }
 0x9d7   :  { %v715_v46 = vadd.f32 %v1257_v39, %v713_v45  ;;  %v943_v45 = vld [vmem:[#allocation2 + $0x18] sm:$0xc0] }
 0x9d9   :  { %v716_v48 = vmax.f32 %v715_v46, 0.0  ;;  %1086 = vmatmul.mubr.msk.f32.vlgmr.msra.gmra.mrb[8].mxu0 %vm146_vm2, %v715_v46 }
 0x9da   :  { %1207 = vmatpush1.bf16.msra.mxu0 %v1389_v8  ;;  %1012 = vmatprep.mubr.f32.mxu0 %v1327_v0  ;;  %v719_v8 = vld [vmem:[#allocation2 + $0x10] sm:$0xc] }
 0x9db   :  { %718 = vst.msk [vmem:[#allocation6 + $0x8] sm:$0x3] %vm273_vm3, %v716_v48  ;;  %1209 = vmatprep.subr.bf16.mxu0 %v1395_v12 }
 0x9de   :  { %1211 = vmatpush1.bf16.msra.mxu0 %v1399_v16 }
 0x9df   :  { %1213 = vmatprep.subr.bf16.mxu0 %v1402_v18 }
 0x9e2   :  { %1215 = vmatpush1.bf16.msra.mxu0 %v1409_v23  ;;  %v720_v23 = vld [vmem:[#allocation2 + $0x18] sm:$0xc] }
 0x9e3   :  { %1217 = vmatprep.subr.bf16.mxu0 %v1412_v24 }
 0x9e6   :  { %1219 = vmatpush1.bf16.msra.mxu0 %v1417_v27 }
 0xaac   :  { %v790_v49 = vpop.f32.mrb[8].mxu0 }
 0xaad   :  { %v796_v50 = vrot.slane %v790_v49, 6  ;;  %v792_v51 = vpop.f32.mrb[9].mxu0 }
 0xaae   :  { %v805_v12 = vadd.f32 %v1446_v47, %v792_v51 }
 0xaaf   :  { %v798_v52 = vadd.f32 %v796_v50, %v719_v8 }
 0xab0   :  { %v807_v16 = vrot.slane %v805_v12, 6 }
 0xab1   :  { %v1087_v0 = vmul.f32 -1.442695, %v798_v52 }
 0xab3   :  { %1258 = vpow2.f32 %v1087_v0 }
 0xabd   :  { %v1259_v53 = vpop.eup %1258 }
 0xabe   :  { %v802_v54 = vadd.f32 1.0, %v1259_v53 }
 0xac0   :  { %1260 = vrcp.f32 %v802_v54 }
 0xaca   :  { %v1261_v18 = vpop.eup %1260 }
 0xacb   :  { %v809_v55 = vmul.f32 %v1261_v18, %v807_v16 }
 0xacd   :  { %v810_v56 = vadd.f32 %v809_v55, %v720_v23 }
 0xacf   :  { %1262 = vtanh.f32 %v810_v56 }
 0xad9   :  { %v1263_v24 = vpop.eup %1262 }
 0xada   :  { %v813_v27 = vrot.slane %v1263_v24, 2 }
 0xadc   :  { %v815_v57 = vsub.f32 %v715_v46, %v813_v27 }
 0xade   :  { %v817_v58 = vrot.slane %v815_v57, 6 }
 0xae0   :  { %818 = vrot.lane.b32.xlu0 %v817_v58, %s1328_s21 }
 0xb52   :  { %v819_v59 = vpop.permute.xlu0 %818 }
 0xb53   :  { %v821_v60 = vmul.f32 %v1261_v18, %v819_v59 }
 0xb55   :  { %823 = vrot.lane.b32.xlu1 %v821_v60, %s1328_s21 }
 0xbc7   :  { %v824_v61 = vpop.permute.xlu1 %823 }
 0xbc8   :  { %v826_v62 = vadd.f32 %v1263_v24, %v824_v61 }
 0xbca   :  { %v827_v63 = vmax.f32 %v826_v62, 0.0  ;;  %v833_v1 = vrot.slane %v826_v62, 2 }
 0xbcc   :  { %829 = vst.msk [vmem:[#allocation6 + $0x8] sm:$0xc] %vm385_vm4, %v827_v63  ;;  %1088 = vmatmul.mubr.msk.f32.vlgmr.msra.gmra.mrb[6].mxu1 %vm146_vm2, %v833_v1 }
 0xc9f   :  { %v902_v2 = vpop.f32.mrb[6].mxu1 }
 0xca0   :  { %v908_v3 = vrot.slane %v902_v2, 4  ;;  %v904_v5 = vpop.f32.mrb[7].mxu1 }
 0xca1   :  { %v917_v13 = vadd.f32 %v1446_v47, %v904_v5 }
 0xca2   :  { %v910_v7 = vadd.f32 %v908_v3, %v830_v6 }
 0xca3   :  { %v919_v4 = vrot.slane %v917_v13, 4 }
 0xca4   :  { %v1089_v9 = vmul.f32 -1.442695, %v910_v7 }
 0xca6   :  { %1264 = vpow2.f32 %v1089_v9 }
 0xcb0   :  { %v1265_v10 = vpop.eup %1264 }
 0xcb1   :  { %v914_v11 = vadd.f32 1.0, %v1265_v10 }
 0xcb3   :  { %1266 = vrcp.f32 %v914_v11 }
 0xcbd   :  { %v1267_v14 = vpop.eup %1266 }
 0xcbe   :  { %v921_v15 = vmul.f32 %v1267_v14, %v919_v4 }
 0xcc0   :  { %v922_v19 = vadd.f32 %v921_v15, %v831_v17 }
 0xcc2   :  { %1268 = vtanh.f32 %v922_v19 }
 0xccc   :  { %v1269_v20 = vpop.eup %1268 }
 0xccd   :  { %v925_v21 = vrot.slane %v1269_v20, 2 }
 0xccf   :  { %v927_v22 = vsub.f32 %v826_v62, %v925_v21 }
 0xcd1   :  { %v929_v25 = vrot.slane %v927_v22, 6 }
 0xcd3   :  { %930 = vrot.lane.b32.xlu0 %v929_v25, %s1328_s21 }
 0xd45   :  { %v931_v26 = vpop.permute.xlu0 %930 }
 0xd46   :  { %v933_v28 = vmul.f32 %v1267_v14, %v931_v26 }
 0xd48   :  { %935 = vrot.lane.b32.xlu1 %v933_v28, %s1328_s21 }
 0xdba   :  { %v936_v29 = vpop.permute.xlu1 %935 }
 0xdbb   :  { %v938_v30 = vadd.f32 %v1269_v20, %v936_v29 }
 0xdbd   :  { %v939_v31 = vmax.f32 %v938_v30, 0.0  ;;  %v945_v32 = vrot.slane %v938_v30, 4 }
 0xdbf   :  { %941 = vst.msk [vmem:[#allocation6 + $0x8] sm:$0x30] %vm498_vm5, %v939_v31  ;;  %1090 = vmatmul.mubr.msk.f32.vlgmr.msra.gmra.mrb[10].mxu0 %vm146_vm2, %v945_v32 }
 0xe92   :  { %v1014_v33 = vpop.f32.mrb[10].mxu0 }
 0xe93   :  { %v1020_v34 = vrot.slane %v1014_v33, 2  ;;  %v1016_v35 = vpop.f32.mrb[11].mxu0 }
 0xe94   :  { %v1029_v41 = vadd.f32 %v1446_v47, %v1016_v35 }
 0xe95   :  { %v1022_v37 = vadd.f32 %v1020_v34, %v942_v36 }
 0xe96   :  { %v1031_v42 = vrot.slane %v1029_v41, 2 }
 0xe97   :  { %v1091_v38 = vmul.f32 -1.442695, %v1022_v37 }
 0xe99   :  { %1270 = vpow2.f32 %v1091_v38 }
 0xea3   :  { %v1271_v39 = vpop.eup %1270 }
 0xea4   :  { %v1026_v40 = vadd.f32 1.0, %v1271_v39 }
 0xea6   :  { %1272 = vrcp.f32 %v1026_v40 }
 0xeb0   :  { %v1273_v43 = vpop.eup %1272 }
 0xeb1   :  { %v1033_v44 = vmul.f32 %v1273_v43, %v1031_v42 }
 0xeb3   :  { %v1034_v46 = vadd.f32 %v1033_v44, %v943_v45 }
 0xeb5   :  { %1274 = vtanh.f32 %v1034_v46 }
 0xebf   :  { %v1275_v48 = vpop.eup %1274 }
 0xec0   :  { %v1037_v49 = vrot.slane %v1275_v48, 2 }
 0xec2   :  { %v1039_v50 = vsub.f32 %v938_v30, %v1037_v49 }
 0xec4   :  { %v1041_v51 = vrot.slane %v1039_v50, 6 }
 0xec6   :  { %1042 = vrot.lane.b32.xlu0 %v1041_v51, %s1328_s21 }
 0xf38   :  { %v1043_v8 = vpop.permute.xlu0 %1042 }
 0xf39   :  { %v1045_v52 = vmul.f32 %v1273_v43, %v1043_v8 }
 0xf3b   :  { %1047 = vrot.lane.b32.xlu1 %v1045_v52, %s1328_s21 }
 0xfad   :  { %v1048_v0 = vpop.permute.xlu1 %1047 }
 0xfae   :  { %v1050_v47 = vadd.f32 %v1275_v48, %v1048_v0 }
 0xfb0   :  { %v1051_v53 = vmax.f32 %v1050_v47, 0.0 }
 0xfb2   :  { %1053 = vst.msk [vmem:[#allocation6 + $0x8] sm:$0xc0] %vm611_vm6, %v1051_v53 }
 0xfb3   :  { %1309 = shalt.err (!%p1306_p12)
}
 0xfb4   :  { %s1310_s25 = scalar_lea.hbm %s1554_s6, 256 }
 0xfb5   :  { %p1311_p13 = scmp.ne.s32.totalorder %s1554_s6, %s1310_s25  ;;  %p1314_p0 = scmp.lt.u32.totalorder %s1310_s25, %s1554_s6 }
 0xfb7   :  { %p1316_p1 = pnand %p1314_p0, %p1311_p13 }
 0xfb9   :  { %1319 = shalt.err (!%p1316_p1)
}
 0xfba   :  { %s1330_s30 = smov 32   ;;  %s1331_s7 = smov 2  }
 0xfbb   :  { %1065 = dma.vmem_to_hbm [thread:$0]  %s1060_s5, 256, %s1554_s6, [#allocation5], %s1330_s30, %s1330_s30, %s1331_s7  }
 0xfbc   :  { %1322 = dma.done.wait [#allocation5], 256  }
 0xfbd   :  { %1323 = vsyncadd [#allocation5], 4294967040 }
 0xfbe   :  { %1069 = vsyncpa [#allocation4], 1 }
 0xfbf   :  { %1070 = vsyncpa [#allocation5], 1 }

</bundles_post_ra>
